<compile_context>
chip_gen: v7x
topology: tpu7x:2x2x1
jax: 0.10.0
libtpu: 0.0.40
codegen_flags: <defaults>
</compile_context>

<pallas_src>
import functools

import jax
import jax.numpy as jnp
from jax.experimental import pallas as pl
from jax.experimental.pallas import tpu as pltpu


def _softplus(x):
    # Numerically stable softplus.  For x > 20 the correction term
    # log1p(exp(-x)) < 2.1e-9, i.e. identical to torch.nn.Softplus's
    # threshold branch (return x) at f32 precision.
    return jnp.maximum(x, 0.0) + jnp.log1p(jnp.exp(-jnp.abs(x)))


def _mlp_kernel(x_ref,
                w1_ref, b1_ref,
                w2_ref, b2_ref,
                w3_ref, b3_ref,
                w4_ref, b4_ref,
                w5_ref, b5_ref,
                o_ref):
    """Fused forward for one batch tile.

    Layers 1-4: bf16 x bf16 MXU matmuls, f32 accumulation + bias + ReLU.
    Layer 5 (out_dim == 1): transpose h4, VPU multiply by the w5 column,
    sublane reduce -> batch lands on the lane axis; softplus only touches
    `tile` elements and the store is one lane-dense (1, 1, tile) row.
    """
    x = x_ref[...].astype(jnp.bfloat16)                    # in-kernel VPU cast

    def hidden(h_bf16, w_ref, b_ref):
        a = jnp.dot(h_bf16, w_ref[...], preferred_element_type=jnp.float32)
        return jnp.maximum(a + b_ref[...], 0.0)            # f32 bias + ReLU

    h = hidden(x, w1_ref, b1_ref).astype(jnp.bfloat16)     # (tile, 256)
    h = hidden(h, w2_ref, b2_ref).astype(jnp.bfloat16)     # (tile, 128)
    h = hidden(h, w3_ref, b3_ref).astype(jnp.bfloat16)     # (tile, 256)
    h4 = hidden(h, w4_ref, b4_ref)                         # (tile, 128) f32

    # Final layer: batch -> lane axis.
    h4t = h4.T                                             # (128, tile) XLU
    z = jnp.sum(h4t * w5_ref[...], axis=0, keepdims=True)  # (1, tile) f32
    z = z + b5_ref[...]                                    # (1,1) broadcast
    o_ref[...] = _softplus(z).reshape(o_ref.shape).astype(o_ref.dtype)


def prepare_params(params):
    """One-time weight prep (hoisted out of the per-call hot path).

    MXU weights -> bf16, biases -> f32 rows; the final (in_dim, 1) weight
    stays f32 because it is used on the VPU, not the MXU.
    """
    (w1, b1), (w2, b2), (w3, b3), (w4, b4), (w5, b5) = params
    if w5.shape[1] != 1:
        raise ValueError("kernel packs the out_dim==1 head on the lane axis")
    prep = []
    for w, b in ((w1, b1), (w2, b2), (w3, b3), (w4, b4)):
        prep.append(jnp.asarray(w, jnp.bfloat16))
        prep.append(jnp.asarray(b, jnp.float32).reshape(1, -1))
    prep.append(jnp.asarray(w5, jnp.float32))               # (in_dim, 1)
    prep.append(jnp.asarray(b5, jnp.float32).reshape(1, 1))
    return tuple(prep)


def _round_up(n, m):
    return ((n + m - 1) // m) * m


@functools.partial(jax.jit, static_argnames=("batch_tile",))
def metadata_predictor(x, prepared_params, *, batch_tile=1024):
    """Fused MLP forward.  x: [B, input_dim] f32 -> [B, 1] f32."""
    w1, b1, w2, b2, w3, b3, w4, b4, w5, b5 = prepared_params
    B, input_dim = x.shape

    # MXU/lane aligned tile, large enough to amortise per-step overhead,
    # capped so big batches give >= 2 grid steps (dual-TC chips) and tiny
    # batches never use a block wildly larger than the array.
    tile = max(8, min(batch_tile,
                      max(256, _round_up(pl.cdiv(B, 2), 256)),
                      _round_up(B, 8)))
    num_tiles = pl.cdiv(B, tile)

    whole = lambda i: (0, 0)
    in_specs = [pl.BlockSpec((tile, input_dim), lambda i: (i, 0))]
    operands = [x]
    for w, b in ((w1, b1), (w2, b2), (w3, b3), (w4, b4), (w5, b5)):
        in_specs.append(pl.BlockSpec(w.shape, whole))
        in_specs.append(pl.BlockSpec(b.shape, whole))
        operands.extend((w, b))

    out = pl.pallas_call(
        _mlp_kernel,
        out_shape=jax.ShapeDtypeStruct((num_tiles, 1, tile), jnp.float32),
        grid_spec=pltpu.PrefetchScalarGridSpec(
            num_scalar_prefetch=0,
            grid=(num_tiles,),
            in_specs=in_specs,
            out_specs=pl.BlockSpec((1, 1, tile), lambda i: (i, 0, 0)),
        ),
        compiler_params=pltpu.CompilerParams(
            dimension_semantics=("parallel",),
        ),
    )(*operands)

    # Unpack the lane-dense tiles back to [B, 1]; rows >= B are padded junk
    # from the partial last input block and are sliced off here.
    return out.reshape(num_tiles * tile)[:B].reshape(B, 1)


def init_params(key, input_dim=128, hidden_dim=256, output_dim=1):
    """Deterministic init mirroring MetaDataPredictor's layer shapes.

    PyTorch nn.Linear uses U(-1/sqrt(in), 1/sqrt(in)); we reproduce that
    distribution deterministically (not the exact torch values).
    """
    dims = [
        (input_dim, hidden_dim),
        (hidden_dim, hidden_dim // 2),
        (hidden_dim // 2, hidden_dim),
        (hidden_dim, hidden_dim // 2),
        (hidden_dim // 2, output_dim),
    ]
    params = []
    for (d_in, d_out) in dims:
        key, kw, kb = jax.random.split(key, 3)
        bound = 1.0 / jnp.sqrt(d_in)
        w = jax.random.uniform(kw, (d_in, d_out), jnp.float32, -bound, bound)
        b = jax.random.uniform(kb, (1, d_out), jnp.float32, -bound, bound)
        params.append((w, b))
    return params


def _reference(x, params):
    # Full-f32 reference matching torch.nn.Softplus(beta=1, threshold=20).
    h = x
    for i, (w, b) in enumerate(params):
        h = h @ w + b
        if i < len(params) - 1:
            h = jnp.maximum(h, 0.0)
    return jnp.where(h > 20.0, h, jnp.log1p(jnp.exp(h)))


if __name__ == "__main__":
    key = jax.random.PRNGKey(0)
    k_x1, k_x2, k_p = jax.random.split(key, 3)

    INPUT_DIM, HIDDEN_DIM, OUTPUT_DIM = 128, 256, 1
    params = init_params(k_p, INPUT_DIM, HIDDEN_DIM, OUTPUT_DIM)
    prepared = prepare_params(params)

    # (a) tiny single-tile batch, (b) multi-tile batch with a ragged last tile.
    for kk, B in ((k_x1, 8), (k_x2, 300)):
        x = jax.random.normal(kk, (B, INPUT_DIM), jnp.float32)
        out = jax.block_until_ready(metadata_predictor(x, prepared))
        ref = _reference(x, params)
        assert out.shape == (B, OUTPUT_DIM), out.shape
        err = jnp.max(jnp.abs(out - ref))
        # bf16 MXU operands (f32 accumulation) -> looser tolerance vs f32 ref.
        assert jnp.allclose(out, ref, atol=5e-2, rtol=5e-2), (
            f"B={B}: max abs err {err}")

    print("KERNEL_OK")
</pallas_src>

<mosaic_0001>
module attributes {stable_mosaic.version = 11 : i64} {
  func.func @_mlp_kernel(%arg0: i32, %arg1: memref<8x128xf32, #tpu.memory_space<vmem>>, %arg2: memref<128x256xbf16, #tpu.memory_space<vmem>>, %arg3: memref<1x256xf32, #tpu.memory_space<vmem>>, %arg4: memref<256x128xbf16, #tpu.memory_space<vmem>>, %arg5: memref<1x128xf32, #tpu.memory_space<vmem>>, %arg6: memref<128x256xbf16, #tpu.memory_space<vmem>>, %arg7: memref<1x256xf32, #tpu.memory_space<vmem>>, %arg8: memref<256x128xbf16, #tpu.memory_space<vmem>>, %arg9: memref<1x128xf32, #tpu.memory_space<vmem>>, %arg10: memref<128x1xf32, #tpu.memory_space<vmem>>, %arg11: memref<1x1xf32, #tpu.memory_space<vmem>>, %arg12: memref<1x1x8xf32, #tpu.memory_space<vmem>>) attributes {dimension_semantics = [#tpu.dimension_semantics<parallel>], iteration_bounds = array<i64: 1>, scalar_prefetch = 0 : i64, scratch_operands = 0 : i64, tpu.core_type = #tpu.core_type<tc>, window_params = [{transform_indices = @transform_0, window_bounds = array<i64: 8, 128>}, {pipeline_mode = #tpu.pipeline_mode<synchronous>, transform_indices = @transform_1, window_bounds = array<i64: 128, 256>}, {pipeline_mode = #tpu.pipeline_mode<synchronous>, transform_indices = @transform_2, window_bounds = array<i64: 1, 256>}, {pipeline_mode = #tpu.pipeline_mode<synchronous>, transform_indices = @transform_3, window_bounds = array<i64: 256, 128>}, {pipeline_mode = #tpu.pipeline_mode<synchronous>, transform_indices = @transform_4, window_bounds = array<i64: 1, 128>}, {pipeline_mode = #tpu.pipeline_mode<synchronous>, transform_indices = @transform_5, window_bounds = array<i64: 128, 256>}, {pipeline_mode = #tpu.pipeline_mode<synchronous>, transform_indices = @transform_6, window_bounds = array<i64: 1, 256>}, {pipeline_mode = #tpu.pipeline_mode<synchronous>, transform_indices = @transform_7, window_bounds = array<i64: 256, 128>}, {pipeline_mode = #tpu.pipeline_mode<synchronous>, transform_indices = @transform_8, window_bounds = array<i64: 1, 128>}, {pipeline_mode = #tpu.pipeline_mode<synchronous>, transform_indices = @transform_9, window_bounds = array<i64: 128, 1>}, {pipeline_mode = #tpu.pipeline_mode<synchronous>, transform_indices = @transform_10, window_bounds = array<i64: 1, 1>}, {transform_indices = @transform_11, window_bounds = array<i64: 1, 1, 8>}]} {
    %c0 = arith.constant 0 : index
    %c0_0 = arith.constant 0 : index
    %0 = vector.load %arg1[%c0, %c0_0] : memref<8x128xf32, #tpu.memory_space<vmem>>, vector<8x128xf32>
    %1 = arith.truncf %0 : vector<8x128xf32> to vector<8x128xbf16>
    %c0_1 = arith.constant 0 : index
    %c0_2 = arith.constant 0 : index
    %2 = vector.load %arg2[%c0_1, %c0_2] : memref<128x256xbf16, #tpu.memory_space<vmem>>, vector<128x256xbf16>
    %cst = arith.constant dense<0.000000e+00> : vector<8x256xf32>
    %3 = tpu.matmul %1, %2, %cst {dimension_numbers = #tpu.dot_dimension_numbers<[1], [0], [0], [1], [0, 0, 1, 1], [], []>} : vector<8x128xbf16>, vector<128x256xbf16>, vector<8x256xf32> -> vector<8x256xf32>
    %c0_3 = arith.constant 0 : index
    %c0_4 = arith.constant 0 : index
    %4 = vector.load %arg3[%c0_3, %c0_4] : memref<1x256xf32, #tpu.memory_space<vmem>>, vector<1x256xf32>
    %5 = vector.broadcast %4 : vector<1x256xf32> to vector<8x256xf32>
    %6 = arith.addf %3, %5 : vector<8x256xf32>
    %cst_5 = arith.constant 0.000000e+00 : f32
    %7 = vector.broadcast %cst_5 : f32 to vector<8x256xf32>
    %8 = arith.maximumf %6, %7 : vector<8x256xf32>
    %9 = arith.truncf %8 : vector<8x256xf32> to vector<8x256xbf16>
    %c0_6 = arith.constant 0 : index
    %c0_7 = arith.constant 0 : index
    %10 = vector.load %arg4[%c0_6, %c0_7] : memref<256x128xbf16, #tpu.memory_space<vmem>>, vector<256x128xbf16>
    %cst_8 = arith.constant dense<0.000000e+00> : vector<8x128xf32>
    %11 = tpu.matmul %9, %10, %cst_8 {dimension_numbers = #tpu.dot_dimension_numbers<[1], [0], [0], [1], [0, 0, 1, 1], [], []>} : vector<8x256xbf16>, vector<256x128xbf16>, vector<8x128xf32> -> vector<8x128xf32>
    %c0_9 = arith.constant 0 : index
    %c0_10 = arith.constant 0 : index
    %12 = vector.load %arg5[%c0_9, %c0_10] : memref<1x128xf32, #tpu.memory_space<vmem>>, vector<1x128xf32>
    %13 = vector.broadcast %12 : vector<1x128xf32> to vector<8x128xf32>
    %14 = arith.addf %11, %13 : vector<8x128xf32>
    %cst_11 = arith.constant 0.000000e+00 : f32
    %15 = vector.broadcast %cst_11 : f32 to vector<8x128xf32>
    %16 = arith.maximumf %14, %15 : vector<8x128xf32>
    %17 = arith.truncf %16 : vector<8x128xf32> to vector<8x128xbf16>
    %c0_12 = arith.constant 0 : index
    %c0_13 = arith.constant 0 : index
    %18 = vector.load %arg6[%c0_12, %c0_13] : memref<128x256xbf16, #tpu.memory_space<vmem>>, vector<128x256xbf16>
    %cst_14 = arith.constant dense<0.000000e+00> : vector<8x256xf32>
    %19 = tpu.matmul %17, %18, %cst_14 {dimension_numbers = #tpu.dot_dimension_numbers<[1], [0], [0], [1], [0, 0, 1, 1], [], []>} : vector<8x128xbf16>, vector<128x256xbf16>, vector<8x256xf32> -> vector<8x256xf32>
    %c0_15 = arith.constant 0 : index
    %c0_16 = arith.constant 0 : index
    %20 = vector.load %arg7[%c0_15, %c0_16] : memref<1x256xf32, #tpu.memory_space<vmem>>, vector<1x256xf32>
    %21 = vector.broadcast %20 : vector<1x256xf32> to vector<8x256xf32>
    %22 = arith.addf %19, %21 : vector<8x256xf32>
    %cst_17 = arith.constant 0.000000e+00 : f32
    %23 = vector.broadcast %cst_17 : f32 to vector<8x256xf32>
    %24 = arith.maximumf %22, %23 : vector<8x256xf32>
    %25 = arith.truncf %24 : vector<8x256xf32> to vector<8x256xbf16>
    %c0_18 = arith.constant 0 : index
    %c0_19 = arith.constant 0 : index
    %26 = vector.load %arg8[%c0_18, %c0_19] : memref<256x128xbf16, #tpu.memory_space<vmem>>, vector<256x128xbf16>
    %cst_20 = arith.constant dense<0.000000e+00> : vector<8x128xf32>
    %27 = tpu.matmul %25, %26, %cst_20 {dimension_numbers = #tpu.dot_dimension_numbers<[1], [0], [0], [1], [0, 0, 1, 1], [], []>} : vector<8x256xbf16>, vector<256x128xbf16>, vector<8x128xf32> -> vector<8x128xf32>
    %c0_21 = arith.constant 0 : index
    %c0_22 = arith.constant 0 : index
    %28 = vector.load %arg9[%c0_21, %c0_22] : memref<1x128xf32, #tpu.memory_space<vmem>>, vector<1x128xf32>
    %29 = vector.broadcast %28 : vector<1x128xf32> to vector<8x128xf32>
    %30 = arith.addf %27, %29 : vector<8x128xf32>
    %cst_23 = arith.constant 0.000000e+00 : f32
    %31 = vector.broadcast %cst_23 : f32 to vector<8x128xf32>
    %32 = arith.maximumf %30, %31 : vector<8x128xf32>
    %33 = tpu.transpose %32, [1, 0] : vector<8x128xf32> -> vector<128x8xf32>
    %c0_24 = arith.constant 0 : index
    %c0_25 = arith.constant 0 : index
    %34 = vector.load %arg10[%c0_24, %c0_25] : memref<128x1xf32, #tpu.memory_space<vmem>>, vector<128x1xf32>
    %35 = vector.broadcast %34 : vector<128x1xf32> to vector<128x8xf32>
    %36 = arith.mulf %33, %35 : vector<128x8xf32>
    %cst_26 = arith.constant dense<0.000000e+00> : vector<8xf32>
    %37 = vector.multi_reduction <add>, %36, %cst_26 [0] : vector<128x8xf32> to vector<8xf32>
    %38 = vector.shape_cast %37 : vector<8xf32> to vector<1x8xf32>
    %c0_27 = arith.constant 0 : index
    %c0_28 = arith.constant 0 : index
    %39 = vector.load %arg11[%c0_27, %c0_28] : memref<1x1xf32, #tpu.memory_space<vmem>>, vector<1x1xf32>
    %40 = vector.broadcast %39 : vector<1x1xf32> to vector<1x8xf32>
    %41 = arith.addf %38, %40 : vector<1x8xf32>
    %cst_29 = arith.constant 0.000000e+00 : f32
    %42 = vector.broadcast %cst_29 : f32 to vector<1x8xf32>
    %43 = arith.maximumf %41, %42 : vector<1x8xf32>
    %44 = math.absf %41 : vector<1x8xf32>
    %cst_30 = arith.constant 0.000000e+00 : f32
    %45 = vector.broadcast %cst_30 : f32 to vector<1x8xf32>
    %46 = arith.subf %45, %44 : vector<1x8xf32>
    %47 = math.exp %46 : vector<1x8xf32>
    %48 = math.log1p %47 : vector<1x8xf32>
    %49 = arith.addf %43, %48 : vector<1x8xf32>
    %50 = vector.shape_cast %49 : vector<1x8xf32> to vector<1x1x8xf32>
    %c0_31 = arith.constant 0 : index
    %c0_32 = arith.constant 0 : index
    %c0_33 = arith.constant 0 : index
    %51 = vector.load %arg12[%c0_31, %c0_32, %c0_33] : memref<1x1x8xf32, #tpu.memory_space<vmem>>, vector<1x1x8xf32>
    tpu.vector_store %arg12[%c0_31, %c0_32, %c0_33], %50 {strides = array<i32>} : memref<1x1x8xf32, #tpu.memory_space<vmem>>, vector<1x1x8xf32>,
    return
  }
  func.func @transform_0(%arg0: i32) -> (i32, i32) {
    %c0_i32 = arith.constant 0 : i32
    %c0_i32_0 = arith.constant 0 : i32
    return %arg0, %c0_i32 : i32, i32
  }
  func.func @transform_1(%arg0: i32) -> (i32, i32) {
    %c0_i32 = arith.constant 0 : i32
    %c0_i32_0 = arith.constant 0 : i32
    %c0_i32_1 = arith.constant 0 : i32
    return %c0_i32, %c0_i32_0 : i32, i32
  }
  func.func @transform_2(%arg0: i32) -> (i32, i32) {
    %c0_i32 = arith.constant 0 : i32
    %c0_i32_0 = arith.constant 0 : i32
    %c0_i32_1 = arith.constant 0 : i32
    return %c0_i32, %c0_i32_0 : i32, i32
  }
  func.func @transform_3(%arg0: i32) -> (i32, i32) {
    %c0_i32 = arith.constant 0 : i32
    %c0_i32_0 = arith.constant 0 : i32
    %c0_i32_1 = arith.constant 0 : i32
    return %c0_i32, %c0_i32_0 : i32, i32
  }
  func.func @transform_4(%arg0: i32) -> (i32, i32) {
    %c0_i32 = arith.constant 0 : i32
    %c0_i32_0 = arith.constant 0 : i32
    %c0_i32_1 = arith.constant 0 : i32
    return %c0_i32, %c0_i32_0 : i32, i32
  }
  func.func @transform_5(%arg0: i32) -> (i32, i32) {
    %c0_i32 = arith.constant 0 : i32
    %c0_i32_0 = arith.constant 0 : i32
    %c0_i32_1 = arith.constant 0 : i32
    return %c0_i32, %c0_i32_0 : i32, i32
  }
  func.func @transform_6(%arg0: i32) -> (i32, i32) {
    %c0_i32 = arith.constant 0 : i32
    %c0_i32_0 = arith.constant 0 : i32
    %c0_i32_1 = arith.constant 0 : i32
    return %c0_i32, %c0_i32_0 : i32, i32
  }
  func.func @transform_7(%arg0: i32) -> (i32, i32) {
    %c0_i32 = arith.constant 0 : i32
    %c0_i32_0 = arith.constant 0 : i32
    %c0_i32_1 = arith.constant 0 : i32
    return %c0_i32, %c0_i32_0 : i32, i32
  }
  func.func @transform_8(%arg0: i32) -> (i32, i32) {
    %c0_i32 = arith.constant 0 : i32
    %c0_i32_0 = arith.constant 0 : i32
    %c0_i32_1 = arith.constant 0 : i32
    return %c0_i32, %c0_i32_0 : i32, i32
  }
  func.func @transform_9(%arg0: i32) -> (i32, i32) {
    %c0_i32 = arith.constant 0 : i32
    %c0_i32_0 = arith.constant 0 : i32
    %c0_i32_1 = arith.constant 0 : i32
    return %c0_i32, %c0_i32_0 : i32, i32
  }
  func.func @transform_10(%arg0: i32) -> (i32, i32) {
    %c0_i32 = arith.constant 0 : i32
    %c0_i32_0 = arith.constant 0 : i32
    %c0_i32_1 = arith.constant 0 : i32
    return %c0_i32, %c0_i32_0 : i32, i32
  }
  func.func @transform_11(%arg0: i32) -> (i32, i32, i32) {
    %c0_i32 = arith.constant 0 : i32
    %c0_i32_0 = arith.constant 0 : i32
    %c0_i32_1 = arith.constant 0 : i32
    return %arg0, %c0_i32, %c0_i32_0 : i32, i32, i32
  }
}

</mosaic_0001>

<bundles_post_ra>
// kernel: metadata_predictor.1
= control target key start
LH: loop header
LB: loop body
LE: loop exit
PB: predicated region body
PF: predicated region fallthrough
CT: control target
= control target key end

     0   :  { %s1530_s0 = inlined_call_operand.vmem [shape: f32[8,128], index: 0, kind: input, shape index: {}]   ;;  %s1531_s1 = inlined_call_operand.vmem [shape: bf16[128,256], index: 1, kind: input, shape index: {}]   ;;  %s1532_s2 = inlined_call_operand.vmem [shape: f32[1,256], index: 2, kind: input, shape index: {}]   ;;  %s1533_s3 = inlined_call_operand.hbm [shape: bf16[256,128], index: 3, kind: input, shape index: {}]   ;;  %s1534_s4 = inlined_call_operand.vmem [shape: f32[1,128], index: 4, kind: input, shape index: {}]   ;;  %s1535_s5 = inlined_call_operand.hbm [shape: bf16[128,256], index: 5, kind: input, shape index: {}]   ;;  %s1536_s6 = inlined_call_operand.vmem [shape: f32[1,256], index: 6, kind: input, shape index: {}]   ;;  %s1537_s7 = inlined_call_operand.hbm [shape: bf16[256,128], index: 7, kind: input, shape index: {}]   ;;  %s1538_s8 = inlined_call_operand.vmem [shape: f32[1,128], index: 8, kind: input, shape index: {}]   ;;  %s1539_s9 = inlined_call_operand.vmem [shape: f32[128,1], index: 9, kind: input, shape index: {}]   ;;  %s1540_s10 = inlined_call_operand.<no memory space> [shape: f32[1,1], index: 10, kind: input, shape index: {}]   ;;  %s1541_s11 = inlined_call_operand.hbm [shape: f32[1,1,8], index: 11, kind: output, shape index: {}]  }
   0x1   :  { %v16_v0 = vstv %s1540_s10 }
   0x2   :  { %17 = vst [vmem:[#allocation2] sm:$0x1] %v16_v0 }
   0x3   :  { %18 = vsyncpa [#allocation4], 0 }
   0x4   :  { %19 = vsyncpa [#allocation7], 0 }
   0x5   :  { %20 = vsyncpa [#allocation5], 0  ;;  %s1270_s19 = smov [#allocation6]   ;;  %s1176_s23 = scalar_lea.hbm %s1535_s5, 2048 }
   0x6   :  { %s46_s20 = sshll.u32 %s1270_s19, 4  ;;  %p1177_p0 = scmp.ne.s32.totalorder %s1535_s5, %s1176_s23  ;;  %s47_s20 = int_to_ptr.vmem [resolvable:$true] %s46_s20 }
   0x7   :  { %p1180_p1 = scmp.lt.u32.totalorder %s1176_s23, %s1535_s5 }
   0x9   :  { %p1182_p2 = pnand %p1180_p1, %p1177_p0 }
   0xb   :  { %1185 = shalt.err (!%p1182_p2)
}
   0xc   :  { %s1186_s10 = scalar_lea.vmem %s47_s20, 2048  ;;  %p1191_p4 = scmp.lt.s32.totalorder %s47_s20, %s47_s20 }
   0xd   :  { %p1187_p3 = scmp.ne.s32.totalorder %s47_s20, %s1186_s10  ;;  %p1192_p5 = scmp.lt.s32.totalorder %s1186_s10, %s1186_s10 }
   0xf   :  { %p1193_p6 = por %p1192_p5, %p1191_p4 }
  0x11   :  { %p1194_p7 = pnand %p1193_p6, %p1187_p3 }
  0x13   :  { %1197 = shalt.err (!%p1194_p7)
}
  0x14   :  { %s1271_s28 = smov 128   ;;  %s1272_s29 = smov 8  }
  0x15   :  { %52 = dma.hbm_to_vmem [thread:$0]  %s1535_s5, 2048, %s47_s20, [#allocation7], %s1271_s28, %s1271_s28, %s1272_s29  }
  0x16   :  { %s1273_s13 = smov [#allocation3]   ;;  %s1198_s17 = scalar_lea.hbm %s1533_s3, 2048 }
  0x17   :  { %s32_s14 = sshll.u32 %s1273_s13, 4  ;;  %p1199_p8 = scmp.ne.s32.totalorder %s1533_s3, %s1198_s17  ;;  %s33_s14 = int_to_ptr.vmem [resolvable:$true] %s32_s14 }
  0x18   :  { %p1202_p9 = scmp.lt.u32.totalorder %s1198_s17, %s1533_s3 }
  0x1a   :  { %p1204_p10 = pnand %p1202_p9, %p1199_p8 }
  0x1c   :  { %1207 = shalt.err (!%p1204_p10)
}
  0x1d   :  { %s1208_s23 = scalar_lea.vmem %s33_s14, 2048  ;;  %p1213_p12 = scmp.lt.s32.totalorder %s33_s14, %s33_s14 }
  0x1e   :  { %p1209_p11 = scmp.ne.s32.totalorder %s33_s14, %s1208_s23  ;;  %p1214_p13 = scmp.lt.s32.totalorder %s1208_s23, %s1208_s23 }
  0x20   :  { %p1215_p0 = por %p1214_p13, %p1213_p12 }
  0x22   :  { %p1216_p1 = pnand %p1215_p0, %p1209_p11 }
  0x24   :  { %1219 = shalt.err (!%p1216_p1)
}
  0x25   :  { %s1274_s5 = smov 64   ;;  %s1275_s20 = smov 4  }
  0x26   :  { %38 = dma.hbm_to_vmem [thread:$0]  %s1533_s3, 2048, %s33_s14, [#allocation4], %s1274_s5, %s1274_s5, %s1275_s20  }
  0x27   :  { %s1276_s26 = smov [#allocation8]   ;;  %s1220_s29 = scalar_lea.hbm %s1537_s7, 2048 }
  0x28   :  { %s60_s27 = sshll.u32 %s1276_s26, 4  ;;  %p1221_p2 = scmp.ne.s32.totalorder %s1537_s7, %s1220_s29  ;;  %s61_s27 = int_to_ptr.vmem [resolvable:$true] %s60_s27 }
  0x29   :  { %p1224_p3 = scmp.lt.u32.totalorder %s1220_s29, %s1537_s7 }
  0x2b   :  { %p1226_p4 = pnand %p1224_p3, %p1221_p2 }
  0x2d   :  { %1229 = shalt.err (!%p1226_p4)
}
  0x2e   :  { %s1230_s16 = scalar_lea.vmem %s61_s27, 2048  ;;  %p1235_p6 = scmp.lt.s32.totalorder %s61_s27, %s61_s27 }
  0x2f   :  { %p1231_p5 = scmp.ne.s32.totalorder %s61_s27, %s1230_s16  ;;  %p1236_p7 = scmp.lt.s32.totalorder %s1230_s16, %s1230_s16 }
  0x31   :  { %p1237_p8 = por %p1236_p7, %p1235_p6 }
  0x33   :  { %p1238_p9 = pnand %p1237_p8, %p1231_p5 }
  0x35   :  { %1241 = shalt.err (!%p1238_p9)
}
  0x36   :  { %66 = dma.hbm_to_vmem [thread:$0]  %s1537_s7, 2048, %s61_s27, [#allocation7], %s1274_s5, %s1274_s5, %s1275_s20  }
  0x37   :  { %1264 = dma.done.wait [#allocation4], 2048  }
  0x38   :  { %1265 = vsyncadd [#allocation4], 4294965248 }
  0x39   :  { %1266 = dma.done.wait [#allocation7], 4096  }
  0x3a   :  { %1267 = vsyncadd [#allocation7], 4294963200  ;;  %v1277_v1 = vmov 0   ;;  %v1092_v2 = vld [vmem:[%s1531_s1 + $0x4] ss:$8 sps:$4 sm:$0xff]   ;;  %v1120_v16 = vld [vmem:[#allocation3 + $0x50] sm:$0xff]   ;;  %v103_v48 = vlaneseq }
  0x3b   :  { %225 = vmatprep.mubr.bf16.mxu0 %v1277_v1  ;;  %1091 = vset.pattern.permute.xlu1 %v1277_v1  ;;  %v1094_v3 = vld [vmem:[%s1531_s1] ss:$8 sps:$4 sm:$0xff]   ;;  %v1095_v4 = vld [vmem:[%s1531_s1 + $0x14] ss:$8 sps:$4 sm:$0xff]   ;;  %v1097_v5 = vld [vmem:[%s1531_s1 + $0x10] ss:$8 sps:$4 sm:$0xff]  }
  0x3c   :  { %1090 = vset.pattern.permute.xlu0 %v1277_v1  ;;  %193 = vmatprep.subr.bf16.mxu0 %v1092_v2  ;;  %v1098_v6 = vld [vmem:[%s1531_s1 + $0x24] ss:$8 sps:$4 sm:$0xff]   ;;  %v1100_v7 = vld [vmem:[%s1531_s1 + $0x20] ss:$8 sps:$4 sm:$0xff]   ;;  %v1101_v8 = vld [vmem:[%s1531_s1 + $0x34] ss:$8 sps:$4 sm:$0xff]  }
  0x3d   :  { %194 = vmatpush1.bf16.msra.mxu0 %v1094_v3  ;;  %v1103_v9 = vld [vmem:[%s1531_s1 + $0x30] ss:$8 sps:$4 sm:$0xff]   ;;  %v1104_v10 = vld [vmem:[%s1531_s1 + $0x44] ss:$8 sps:$4 sm:$0xff]   ;;  %v1106_v13 = vld [vmem:[%s1531_s1 + $0x40] ss:$8 sps:$4 sm:$0xff]  }
  0x3e   :  { %195 = vmatprep.subr.bf16.mxu0 %v1095_v4  ;;  %v1116_v11 = vld [vmem:[#allocation3 + $0x40] sm:$0xff]   ;;  %v1118_v14 = vld [vmem:[#allocation3 + $0x48] sm:$0xff]   ;;  %v1107_v17 = vld [vmem:[%s1531_s1 + $0x54] ss:$8 sps:$4 sm:$0xff]   ;;  %v1429_v49 = vshrl.u32 %v103_v48, 7  ;;  %vm888_vm0 = vcmask 64512  }
  0x3f   :  { %v1117_v12 = vld [vmem:[#allocation3] sm:$0xff]   ;;  %1036 = vmatprep.subr.bf16.mxu1 %v1116_v11  ;;  %v1119_v15 = vld [vmem:[#allocation3 + $0x8] sm:$0xff]   ;;  %v1121_v19 = vld [vmem:[#allocation3 + $0x10] sm:$0xff]   ;;  %vm952_vm2 = vcmask 57344  }
  0x40   :  { %1037 = vmatpush3.bf16.msra.mxu1 %v1117_v12  ;;  %v1109_v18 = vld [vmem:[%s1531_s1 + $0x50] ss:$8 sps:$4 sm:$0xff]   ;;  %v1110_v21 = vld [vmem:[%s1531_s1 + $0x64] ss:$8 sps:$4 sm:$0xff]   ;;  %v1112_v22 = vld [vmem:[%s1531_s1 + $0x60] ss:$8 sps:$4 sm:$0xff]  }
  0x41   :  { %196 = vmatpush1.bf16.msra.mxu0 %v1097_v5  ;;  %1038 = vmatprep.subr.bf16.mxu1 %v1118_v14  ;;  %v1122_v20 = vld [vmem:[#allocation3 + $0x58] sm:$0xff]   ;;  %v1124_v25 = vld [vmem:[#allocation3 + $0x60] sm:$0xff]   ;;  %v1126_v29 = vld [vmem:[#allocation3 + $0x68] sm:$0xff]   ;;  %v1432_v50 = vsub.s32 0, %v1429_v49  ;;  %v109_v52 = vsub.s32 1, %v1429_v49 }
  0x42   :  { %197 = vmatprep.subr.bf16.mxu0 %v1098_v6  ;;  %v1113_v23 = vld [vmem:[%s1531_s1 + $0x74] ss:$8 sps:$4 sm:$0xff]   ;;  %v1125_v26 = vld [vmem:[#allocation3 + $0x20] sm:$0xff]   ;;  %v1115_v27 = vld [vmem:[%s1531_s1 + $0x70] ss:$8 sps:$4 sm:$0xff]  }
  0x43   :  { %v1123_v24 = vld [vmem:[#allocation3 + $0x18] sm:$0xff]   ;;  %v1127_v30 = vld [vmem:[#allocation3 + $0x28] sm:$0xff]   ;;  %v1128_v32 = vld [vmem:[#allocation3 + $0x70] sm:$0xff]  }
  0x44   :  { %1039 = vmatpush3.bf16.msra.mxu1 %v1119_v15  ;;  %v83_v28 = vld [vmem:[%s1530_s0] sm:$0xff]  ;;  %v1129_v33 = vld [vmem:[#allocation3 + $0x30] sm:$0xff]   ;;  %v1166_v15 = vld [vmem:[#allocation8 + $0x68] sm:$0xff]  }
  0x45   :  { %198 = vmatpush1.bf16.msra.mxu0 %v1100_v7  ;;  %1040 = vmatprep.subr.bf16.mxu1 %v1120_v16  ;;  %v84_v31 = vpack.c.bf16 %v83_v28, %v83_v28  ;;  %v1130_v34 = vld [vmem:[#allocation3 + $0x78] sm:$0xff]   ;;  %v1132_v36 = vld [vmem:[#allocation6] ss:$8 sps:$4 sm:$0xff]   ;;  %v1134_v37 = vld [vmem:[#allocation6 + $0x4] ss:$8 sps:$4 sm:$0xff]  }
  0x46   :  { %199 = vmatprep.subr.bf16.mxu0 %v1101_v8  ;;  %v1131_v35 = vld [vmem:[#allocation3 + $0x38] sm:$0xff]   ;;  %v1140_v40 = vld [vmem:[#allocation6 + $0x24] ss:$8 sps:$4 sm:$0xff]   ;;  %v1138_v41 = vld [vmem:[#allocation6 + $0x20] ss:$8 sps:$4 sm:$0xff]  }
  0x47   :  { %v1137_v38 = vld [vmem:[#allocation6 + $0x14] ss:$8 sps:$4 sm:$0xff]   ;;  %v1135_v39 = vld [vmem:[#allocation6 + $0x10] ss:$8 sps:$4 sm:$0xff]   ;;  %v1146_v44 = vld [vmem:[#allocation6 + $0x44] ss:$8 sps:$4 sm:$0xff]  }
  0x48   :  { %1041 = vmatpush3.bf16.msra.mxu1 %v1121_v19  ;;  %v1143_v42 = vld [vmem:[#allocation6 + $0x34] ss:$8 sps:$4 sm:$0xff]   ;;  %v1141_v43 = vld [vmem:[#allocation6 + $0x30] ss:$8 sps:$4 sm:$0xff]   ;;  %v1144_v45 = vld [vmem:[#allocation6 + $0x40] ss:$8 sps:$4 sm:$0xff]  }
  0x49   :  { %200 = vmatpush1.bf16.msra.mxu0 %v1103_v9  ;;  %1042 = vmatprep.subr.bf16.mxu1 %v1122_v20  ;;  %v1149_v46 = vld [vmem:[#allocation6 + $0x54] ss:$8 sps:$4 sm:$0xff]   ;;  %v1147_v47 = vld [vmem:[#allocation6 + $0x50] ss:$8 sps:$4 sm:$0xff]   ;;  %v1150_v2 = vld [vmem:[#allocation6 + $0x60] ss:$8 sps:$4 sm:$0xff]  }
  0x4a   :  { %201 = vmatprep.subr.bf16.mxu0 %v1104_v10  ;;  %v101_v51 = vld [vmem:[%s1532_s2] sm:$0x3]  ;;  %v1153_v4 = vld [vmem:[#allocation6 + $0x70] ss:$8 sps:$4 sm:$0xff]   ;;  %v1158_v7 = vld [vmem:[#allocation8 + $0x48] sm:$0xff]  }
  0x4b   :  { %v106_v53 = vrot.slane %v101_v51, %v1432_v50  ;;  %v110_v54 = vrot.slane %v101_v51, %v109_v52  ;;  %v1155_v3 = vld [vmem:[#allocation6 + $0x74] ss:$8 sps:$4 sm:$0xff]   ;;  %v1156_v5 = vld [vmem:[#allocation8 + $0x40] sm:$0xff]   ;;  %v1159_v8 = vld [vmem:[#allocation8 + $0x8] sm:$0xff]  }
  0x4c   :  { %1043 = vmatpush3.bf16.msra.mxu1 %v1123_v24  ;;  %v1157_v6 = vld [vmem:[#allocation8] sm:$0xff]   ;;  %v1160_v9 = vld [vmem:[#allocation8 + $0x50] sm:$0xff]   ;;  %v1162_v11 = vld [vmem:[#allocation8 + $0x58] sm:$0xff]  }
  0x4d   :  { %202 = vmatpush1.bf16.msra.mxu0 %v1106_v13  ;;  %1044 = vmatprep.subr.bf16.mxu1 %v1124_v25  ;;  %v1161_v10 = vld [vmem:[#allocation8 + $0x10] sm:$0xff]   ;;  %v1163_v12 = vld [vmem:[#allocation8 + $0x18] sm:$0xff]   ;;  %v1164_v13 = vld [vmem:[#allocation8 + $0x60] sm:$0xff]  }
  0x4e   :  { %203 = vmatprep.subr.bf16.mxu0 %v1107_v17  ;;  %v1165_v14 = vld [vmem:[#allocation8 + $0x20] sm:$0xff]   ;;  %v1167_v16 = vld [vmem:[#allocation8 + $0x28] sm:$0xff]   ;;  %v1170_v28 = vld [vmem:[#allocation8 + $0x78] sm:$0xff]  }
  0x4f   :  { %v777_v49 = vld [vmem:[%s1539_s9 + $0x8] sm:$0xff] }
  0x50   :  { %1045 = vmatpush3.bf16.msra.mxu1 %v1125_v26  ;;  %v1168_v26 = vld [vmem:[#allocation8 + $0x70] sm:$0xff]  }
  0x51   :  { %204 = vmatpush1.bf16.msra.mxu0 %v1109_v18  ;;  %1046 = vmatprep.subr.bf16.mxu1 %v1126_v29  ;;  %v986_v18 = vld [vmem:[%s1534_s4] ss:$0 sm:$0xff] }
  0x52   :  { %205 = vmatprep.subr.bf16.mxu0 %v1110_v21  ;;  %v1171_v29 = vld [vmem:[#allocation8 + $0x38] sm:$0xff]  }
  0x54   :  { %1047 = vmatpush3.bf16.msra.mxu1 %v1127_v30  ;;  %v778_v30 = vld [vmem:[%s1539_s9 + $0x10] sm:$0xff] }
  0x55   :  { %206 = vmatpush1.bf16.msra.mxu0 %v1112_v22  ;;  %1048 = vmatprep.subr.bf16.mxu1 %v1128_v32  ;;  %v781_v32 = vld [vmem:[%s1539_s9 + $0x28] sm:$0xff] }
  0x56   :  { %207 = vmatprep.subr.bf16.mxu0 %v1113_v23  ;;  %804 = vperm.xlu1 %1091, %v778_v30  }
  0x58   :  { %1049 = vmatpush3.bf16.msra.mxu1 %v1129_v33  ;;  %v783_v33 = vld [vmem:[%s1539_s9 + $0x38] sm:$0xff] }
  0x59   :  { %208 = vmatpush1.bf16.msra.mxu0 %v1115_v27  ;;  %1050 = vmatprep.subr.bf16.mxu1 %v1130_v34  ;;  %v1169_v27 = vld [vmem:[#allocation8 + $0x30] sm:$0xff]   ;;  %v785_v34 = vld [vmem:[%s1539_s9 + $0x48] sm:$0xff] }
  0x5a   :  { %523 = vmatprep.subr.bf16.mxu0 %v1134_v37  ;;  %v431_v37 = vld [vmem:[%s1536_s6] sm:$0x3] }
  0x5c   :  { %226 = vmatmul.mubr.bf16.vlgmr.msra.gmra.mrb[0].mxu0 %v84_v31  ;;  %1051 = vmatpush3.bf16.msra.mxu1 %v1131_v35  ;;  %v779_v31 = vld [vmem:[%s1539_s9 + $0x18] sm:$0xff] }
  0x5d   :  { %555 = vmatprep.mubr.bf16.mxu0 %v1277_v1  ;;  %524 = vmatpush1.bf16.msra.mxu0 %v1132_v36  ;;  %v1152_v1 = vld [vmem:[#allocation6 + $0x64] ss:$8 sps:$4 sm:$0xff]   ;;  %v787_v35 = vld [vmem:[%s1539_s9 + $0x58] sm:$0xff] }
  0x5e   :  { %525 = vmatprep.subr.bf16.mxu0 %v1137_v38  ;;  %1058 = vmatprep.subr.bf16.mxu1 %v1156_v5  ;;  %v789_v36 = vld [vmem:[%s1539_s9 + $0x68] sm:$0xff]  ;;  %v436_v38 = vrot.slane %v431_v37, %v1432_v50 }
  0x5f   :  { %809 = vperm.xlu1 %1091, %v779_v31  }
  0x61   :  { %526 = vmatpush1.bf16.msra.mxu0 %v1135_v39  ;;  %v440_v39 = vrot.slane %v431_v37, %v109_v52  ;;  %v780_v52 = vld [vmem:[%s1539_s9 + $0x20] sm:$0xff] }
  0x62   :  { %527 = vmatprep.subr.bf16.mxu0 %v1140_v40 }
  0x63   :  { %819 = vperm.xlu1 %1091, %v781_v32  }
  0x65   :  { %528 = vmatpush1.bf16.msra.mxu0 %v1138_v41 }
  0x66   :  { %529 = vmatprep.subr.bf16.mxu0 %v1143_v42 }
  0x67   :  { %829 = vperm.xlu1 %1091, %v783_v33  }
  0x69   :  { %530 = vmatpush1.bf16.msra.mxu0 %v1141_v43 }
  0x6a   :  { %531 = vmatprep.subr.bf16.mxu0 %v1146_v44 }
  0x6b   :  { %839 = vperm.xlu1 %1091, %v785_v34  }
  0x6d   :  { %532 = vmatpush1.bf16.msra.mxu0 %v1144_v45 }
  0x6e   :  { %533 = vmatprep.subr.bf16.mxu0 %v1149_v46 }
  0x6f   :  { %849 = vperm.xlu1 %1091, %v787_v35  }
  0x71   :  { %534 = vmatpush1.bf16.msra.mxu0 %v1147_v47 }
  0x72   :  { %535 = vmatprep.subr.bf16.mxu0 %v1152_v1 }
  0x73   :  { %859 = vperm.xlu1 %1091, %v789_v36  }
  0x75   :  { %536 = vmatpush1.bf16.msra.mxu0 %v1150_v2 }
  0x76   :  { %537 = vmatprep.subr.bf16.mxu0 %v1155_v3 }
  0x79   :  { %538 = vmatpush1.bf16.msra.mxu0 %v1153_v4 }
  0xd5   :  { %v805_v5 = vpop.permute.xlu1 %804 }
 0x12f   :  { %v227_v55 = vpop.f32.mrb[0].mxu0 }
 0x130   :  { %v228_v56 = vadd.f32 %v227_v55, %v106_v53  ;;  %v229_v57 = vpop.f32.mrb[1].mxu0  ;;  %v776_v53 = vld [vmem:[%s1539_s9] sm:$0xff] }
 0x131   :  { %v230_v58 = vadd.f32 %v229_v57, %v110_v54  ;;  %v231_v59 = vpop.f32.mrb[2].mxu0  ;;  %794 = vperm.xlu0 %1090, %v776_v53   ;;  %v782_v54 = vld [vmem:[%s1539_s9 + $0x30] sm:$0xff]  ;;  %v784_v55 = vld [vmem:[%s1539_s9 + $0x40] sm:$0xff] }
 0x132   :  { %v234_v60 = vmax.f32 %v228_v56, 0.0  ;;  %v232_v61 = vpop.f32.mrb[3].mxu0  ;;  %v786_v56 = vld [vmem:[%s1539_s9 + $0x50] sm:$0xff]  ;;  %v788_v57 = vld [vmem:[%s1539_s9 + $0x60] sm:$0xff]  ;;  %v791_v59 = vld [vmem:[%s1539_s9 + $0x78] sm:$0xff] }
 0x133   :  { %v235_v62 = vmax.f32 %v230_v58, 0.0  ;;  %v790_v58 = vld [vmem:[%s1539_s9 + $0x70] sm:$0xff] }
 0x134   :  { %v236_v0 = vpack.c.bf16 %v234_v60, %v234_v60  ;;  %v926_v60 = vld [vmem:[#allocation2] sm:$0x1] }
 0x135   :  { %v237_v63 = vpack.c.bf16 %v235_v62, %v235_v62  ;;  %799 = vperm.xlu0 %1090, %v777_v49   ;;  %v1019_v62 = vld [vmem:[%s1538_s8] ss:$0 sm:$0xff]  ;;  %s1278_s8 = smov [#allocation9]  }
 0x136   :  { %s960_s9 = sshll.u32 %s1278_s8, 4  ;;  %s961_s9 = int_to_ptr.vmem [resolvable:$true] %s960_s9 }
 0x137   :  { %405 = vmatprep.mubr.bf16.mxu1 %v237_v63  ;;  %s1242_s15 = scalar_lea.vmem %s961_s9, 16  ;;  %s1246_s16 = scalar_lea.vmem %s961_s9, 32 }
 0x138   :  { %406 = vmatmul.mubr.bf16.vlgmr.msra.gmra.mrb[0].mxu1 %v236_v0  ;;  %p1243_p10 = scmp.ne.s32.totalorder %s961_s9, %s1242_s15  ;;  %p1247_p11 = scmp.lt.s32.totalorder %s961_s9, %s961_s9 }
 0x139   :  { %1059 = vmatpush3.bf16.msra.mxu1 %v1157_v6  ;;  %814 = vperm.xlu0 %1090, %v780_v52   ;;  %v810_v6 = vpop.permute.xlu1 %809  ;;  %p1248_p12 = scmp.lt.s32.totalorder %s1246_s16, %s1242_s15 }
 0x13a   :  { %1060 = vmatprep.subr.bf16.mxu1 %v1158_v7 }
 0x13b   :  { %p1249_p13 = por %p1248_p12, %p1247_p11 }
 0x13d   :  { %1061 = vmatpush3.bf16.msra.mxu1 %v1159_v8  ;;  %824 = vperm.xlu0 %1090, %v782_v54   ;;  %v820_v7 = vpop.permute.xlu1 %819  ;;  %p1250_p0 = pnand %p1249_p13, %p1243_p10 }
 0x13e   :  { %1062 = vmatprep.subr.bf16.mxu1 %v1160_v9 }
 0x141   :  { %1063 = vmatpush3.bf16.msra.mxu1 %v1161_v10  ;;  %834 = vperm.xlu0 %1090, %v784_v55   ;;  %v830_v8 = vpop.permute.xlu1 %829 }
 0x142   :  { %1064 = vmatprep.subr.bf16.mxu1 %v1162_v11 }
 0x145   :  { %1065 = vmatpush3.bf16.msra.mxu1 %v1163_v12  ;;  %844 = vperm.xlu0 %1090, %v786_v56   ;;  %v840_v9 = vpop.permute.xlu1 %839 }
 0x146   :  { %1066 = vmatprep.subr.bf16.mxu1 %v1164_v13 }
 0x149   :  { %1067 = vmatpush3.bf16.msra.mxu1 %v1165_v14  ;;  %854 = vperm.xlu0 %1090, %v788_v57   ;;  %v850_v10 = vpop.permute.xlu1 %849 }
 0x14a   :  { %1068 = vmatprep.subr.bf16.mxu1 %v1166_v15 }
 0x14d   :  { %1069 = vmatpush3.bf16.msra.mxu1 %v1167_v16  ;;  %864 = vperm.xlu0 %1090, %v790_v58   ;;  %v860_v11 = vpop.permute.xlu1 %859 }
 0x14e   :  { %1070 = vmatprep.subr.bf16.mxu1 %v1168_v26 }
 0x151   :  { %1071 = vmatpush3.bf16.msra.mxu1 %v1169_v27  ;;  %869 = vperm.xlu0 %1090, %v791_v59  }
 0x152   :  { %1072 = vmatprep.subr.bf16.mxu1 %v1170_v28 }
 0x155   :  { %1073 = vmatpush3.bf16.msra.mxu1 %v1171_v29  ;;  %929 = vperm.xlu0 %1090, %v926_v60  }
 0x1b0   :  { %v795_v15 = vpop.permute.xlu0 %794 }
 0x20b   :  { %v1052_v17 = vpop.f32.mrb[0].mxu1 }
 0x20c   :  { %v1053_v19 = vpop.f32.mrb[1].mxu1 }
 0x20d   :  { %v1054_v20 = vadd.f32 %v1053_v19, %v1052_v17  ;;  %v1055_v21 = vpop.f32.mrb[2].mxu1 }
 0x20e   :  { %v1056_v22 = vpop.f32.mrb[3].mxu1 }
 0x20f   :  { %v408_v23 = vadd.f32 %v1054_v20, %v986_v18  ;;  %v800_v18 = vpop.permute.xlu0 %799 }
 0x211   :  { %v413_v24 = vmax.f32 %v408_v23, 0.0 }
 0x213   :  { %v414_v25 = vpack.c.bf16 %v413_v24, %v413_v24  ;;  %v815_v20 = vpop.permute.xlu0 %814 }
 0x215   :  { %556 = vmatmul.mubr.bf16.vlgmr.msra.gmra.mrb[4].mxu0 %v414_v25 }
 0x217   :  { %v825_v24 = vpop.permute.xlu0 %824 }
 0x21b   :  { %v835_v34 = vpop.permute.xlu0 %834 }
 0x2e8   :  { %v557_v40 = vpop.f32.mrb[4].mxu0 }
 0x2e9   :  { %v558_v41 = vadd.f32 %v557_v40, %v436_v38  ;;  %v559_v42 = vpop.f32.mrb[5].mxu0 }
 0x2ea   :  { %v560_v43 = vadd.f32 %v559_v42, %v440_v39  ;;  %v561_v44 = vpop.f32.mrb[6].mxu0 }
 0x2eb   :  { %v564_v45 = vmax.f32 %v558_v41, 0.0  ;;  %v562_v46 = vpop.f32.mrb[7].mxu0 }
 0x2ec   :  { %v565_v47 = vmax.f32 %v560_v43, 0.0 }
 0x2ed   :  { %v566_v51 = vpack.c.bf16 %v564_v45, %v564_v45  ;;  %v845_v45 = vpop.permute.xlu0 %844 }
 0x2ee   :  { %v567_v48 = vpack.c.bf16 %v565_v47, %v565_v47 }
 0x2f0   :  { %735 = vmatprep.mubr.bf16.mxu1 %v567_v48 }
 0x2f1   :  { %736 = vmatmul.mubr.bf16.vlgmr.msra.gmra.mrb[4].mxu1 %v566_v51  ;;  %v855_v57 = vpop.permute.xlu0 %854 }
 0x3c4   :  { %v1074_v61 = vpop.f32.mrb[4].mxu1 }
 0x3c5   :  { %v1075_v63 = vpop.f32.mrb[5].mxu1 }
 0x3c6   :  { %v1076_v0 = vadd.f32 %v1075_v63, %v1074_v61  ;;  %v1077_v1 = vpop.f32.mrb[6].mxu1 }
 0x3c7   :  { %v1078_v2 = vpop.f32.mrb[7].mxu1 }
 0x3c8   :  { %v738_v3 = vadd.f32 %v1076_v0, %v1019_v62 }
 0x3ca   :  { %v743_v4 = vmax.f32 %v738_v3, 0.0 }
 0x3cc   :  { %744 = vxpose.xlu1.b32.start.end [1/1] (short) %v743_v4, 128 }
 0x44c   :  { %v760_v12 = vpop.trf.xlu1 }
 0x44d   :  { %v872_v25 = vmul.f32 %v795_v15, %v760_v12 }
 0x44f   :  { %v889_v30 = vsel %vm888_vm0, %v872_v25, 0.0 }
 0x450   :  { %v761_v13 = vpop.trf.xlu1 }
 0x451   :  { %v873_v23 = vmul.f32 %v800_v18, %v761_v13 }
 0x453   :  { %v890_v28 = vsel %vm888_vm0, %v873_v23, 0.0 }
 0x454   :  { %v762_v14 = vpop.trf.xlu1  ;;  %v891_v33 = vadd.f32 %v890_v28, %v889_v30 }
 0x455   :  { %v874_v26 = vmul.f32 %v805_v5, %v762_v14  ;;  %v865_v5 = vpop.permute.xlu0 %864 }
 0x457   :  { %v892_v31 = vsel %vm888_vm0, %v874_v26, 0.0 }
 0x458   :  { %v763_v16 = vpop.trf.xlu1  ;;  %v893_v38 = vadd.f32 %v892_v31, %v891_v33 }
 0x459   :  { %v875_v29 = vmul.f32 %v810_v6, %v763_v16  ;;  %v870_v15 = vpop.permute.xlu0 %869 }
 0x45b   :  { %v894_v36 = vsel %vm888_vm0, %v875_v29, 0.0 }
 0x45c   :  { %v764_v17 = vpop.trf.xlu1  ;;  %v895_v41 = vadd.f32 %v894_v36, %v893_v38 }
 0x45d   :  { %v876_v32 = vmul.f32 %v815_v20, %v764_v17  ;;  %v930_v25 = vpop.permute.xlu0 %929 }
 0x45f   :  { %v896_v39 = vsel %vm888_vm0, %v876_v32, 0.0 }
 0x460   :  { %v765_v19 = vpop.trf.xlu1  ;;  %v897_v46 = vadd.f32 %v896_v39, %v895_v41 }
 0x461   :  { %v877_v37 = vmul.f32 %v820_v7, %v765_v19 }
 0x463   :  { %v898_v43 = vsel %vm888_vm0, %v877_v37, 0.0 }
 0x464   :  { %v766_v21 = vpop.trf.xlu1  ;;  %v899_v51 = vadd.f32 %v898_v43, %v897_v46 }
 0x465   :  { %v878_v40 = vmul.f32 %v825_v24, %v766_v21 }
 0x467   :  { %v900_v47 = vsel %vm888_vm0, %v878_v40, 0.0 }
 0x468   :  { %v767_v22 = vpop.trf.xlu1  ;;  %v901_v54 = vadd.f32 %v900_v47, %v899_v51 }
 0x469   :  { %v879_v44 = vmul.f32 %v830_v8, %v767_v22 }
 0x46b   :  { %v902_v49 = vsel %vm888_vm0, %v879_v44, 0.0 }
 0x46c   :  { %v768_v27 = vpop.trf.xlu1  ;;  %v903_v58 = vadd.f32 %v902_v49, %v901_v54 }
 0x46d   :  { %v880_v48 = vmul.f32 %v835_v34, %v768_v27  ;;  %v935_v27 = vrot.slane %v930_v25, %v1432_v50 }
 0x46f   :  { %v904_v55 = vsel %vm888_vm0, %v880_v48, 0.0 }
 0x470   :  { %v769_v35 = vpop.trf.xlu1  ;;  %v905_v62 = vadd.f32 %v904_v55, %v903_v58 }
 0x471   :  { %v881_v52 = vmul.f32 %v840_v9, %v769_v35 }
 0x473   :  { %v906_v60 = vsel %vm888_vm0, %v881_v52, 0.0 }
 0x474   :  { %v770_v42 = vpop.trf.xlu1  ;;  %v907_v1 = vadd.f32 %v906_v60, %v905_v62 }
 0x475   :  { %v882_v56 = vmul.f32 %v845_v45, %v770_v42 }
 0x477   :  { %v908_v63 = vsel %vm888_vm0, %v882_v56, 0.0 }
 0x478   :  { %v771_v53 = vpop.trf.xlu1  ;;  %v909_v6 = vadd.f32 %v908_v63, %v907_v1 }
 0x479   :  { %v883_v61 = vmul.f32 %v850_v10, %v771_v53 }
 0x47b   :  { %v910_v3 = vsel %vm888_vm0, %v883_v61, 0.0 }
 0x47c   :  { %v772_v59 = vpop.trf.xlu1  ;;  %v911_v8 = vadd.f32 %v910_v3, %v909_v6 }
 0x47d   :  { %v884_v0 = vmul.f32 %v855_v57, %v772_v59 }
 0x47f   :  { %v912_v7 = vsel %vm888_vm0, %v884_v0, 0.0 }
 0x480   :  { %v773_v2 = vpop.trf.xlu1  ;;  %v913_v14 = vadd.f32 %v912_v7, %v911_v8 }
 0x481   :  { %v885_v4 = vmul.f32 %v860_v11, %v773_v2 }
 0x483   :  { %v914_v12 = vsel %vm888_vm0, %v885_v4, 0.0 }
 0x484   :  { %v774_v9 = vpop.trf.xlu1  ;;  %v915_v16 = vadd.f32 %v914_v12, %v913_v14 }
 0x485   :  { %v886_v13 = vmul.f32 %v865_v5, %v774_v9 }
 0x487   :  { %v916_v10 = vsel %vm888_vm0, %v886_v13, 0.0 }
 0x488   :  { %v775_v17 = vpop.trf.xlu1  ;;  %v917_v19 = vadd.f32 %v916_v10, %v915_v16 }
 0x489   :  { %v887_v18 = vmul.f32 %v870_v15, %v775_v17 }
 0x48b   :  { %v918_v20 = vsel %vm888_vm0, %v887_v18, 0.0 }
 0x48c   :  { %v919_v11 = vadd.f32 %v918_v20, %v917_v19 }
 0x48e   :  { %v920_v21 = vrot.slane %v919_v11, 4 }
 0x490   :  { %v921_v22 = vadd.f32 %v920_v21, %v919_v11 }
 0x492   :  { %v922_v23 = vrot.slane %v921_v22, 2 }
 0x494   :  { %v923_v24 = vadd.f32 %v922_v23, %v921_v22 }
 0x496   :  { %v924_v26 = vrot.slane %v923_v24, 1 }
 0x498   :  { %v925_v28 = vadd.f32 %v924_v26, %v923_v24 }
 0x49a   :  { %v936_v29 = vadd.f32 %v935_v27, %v925_v28 }
 0x49c   :  { %v938_v30 = vand.u32 2147483647, %v936_v29  ;;  %v937_v41 = vmax.f32 %v936_v29, 0.0 }
 0x49e   :  { %v939_v31 = vsub.f32 0.0, %v938_v30 }
 0x4a0   :  { %v940_v32 = vmul.f32 1.442695, %v939_v31 }
 0x4a2   :  { %1172 = vpow2.f32 %v940_v32 }
 0x4ac   :  { %v1173_v33 = vpop.eup %1172 }
 0x4ad   :  { %v942_v34 = vadd.f32 1.0, %v1173_v33  ;;  %v945_v35 = vmul.f32 -0.5, %v1173_v33  ;;  %v948_v37 = vand.u32 2147483647, %v1173_v33 }
 0x4af   :  { %1174 = vlog2.f32 %v942_v34  ;;  %v946_v36 = vadd.f32 1.0, %v945_v35  ;;  %vm949_vm1 = vcmp.lt.f32.partialorder %v948_v37, 0.0004427343 }
 0x4b1   :  { %v947_v40 = vmul.f32 %v1173_v33, %v946_v36 }
 0x4b9   :  { %v1175_v38 = vpop.eup %1174 }
 0x4ba   :  { %v944_v39 = vmul.f32 0.6931472, %v1175_v38 }
 0x4bc   :  { %v950_v50 = vsel %vm949_vm1, %v947_v40, %v944_v39 }
 0x4bd   :  { %v951_v42 = vadd.f32 %v950_v50, %v937_v41 }
 0x4bf   :  { %953 = vst.msk [vmem:[#allocation9] sm:$0x1] %vm952_vm2, %v951_v42 }
 0x4c0   :  { %1253 = shalt.err (!%p1250_p0)
}
 0x4c1   :  { %s1254_s17 = scalar_lea.hbm %s1541_s11, 16 }
 0x4c2   :  { %p1255_p1 = scmp.ne.s32.totalorder %s1541_s11, %s1254_s17  ;;  %p1258_p2 = scmp.lt.u32.totalorder %s1254_s17, %s1541_s11 }
 0x4c4   :  { %p1260_p3 = pnand %p1258_p2, %p1255_p1 }
 0x4c6   :  { %1263 = shalt.err (!%p1260_p3)
}
 0x4c7   :  { %963 = dma.vmem_to_hbm [thread:$0]  %s961_s9, 16, %s1541_s11, [#allocation5]  }
 0x4c8   :  { %1268 = dma.done.wait [#allocation5], 16  }
 0x4c9   :  { %1269 = vsyncadd [#allocation5], 4294967280 }
 0x4ca   :  { %967 = vsyncpa [#allocation4], 1 }
 0x4cb   :  { %968 = vsyncpa [#allocation7], 1 }
 0x4cc   :  { %969 = vsyncpa [#allocation5], 1 }

</bundles_post_ra>
